<compile_context>
chip_gen: v7x
topology: tpu7x:2x2x1
jax: 0.10.0
libtpu: 0.0.40
codegen_flags: <defaults>
</compile_context>

<pallas_src>
import math

import jax
import jax.numpy as jnp
from jax.experimental import pallas as pl
from jax.experimental.pallas import tpu as pltpu

LN_EPS = 1e-5  # PyTorch nn.LayerNorm default


def _head_kernel(ctx_ref, w1_ref, bias1_ref, w2_ref, b2_ref, out_ref, h_ref):
    """Grid (i, j): batch tile i, W2 output-column tile j.

    j == 0 : h = ReLU(LayerNorm(ctx @ W1 + b1))  -> VMEM scratch (persists)
    all j  : out[:, j-tile] = h @ W2[:, j-tile] + b2[j-tile]
    """
    j = pl.program_id(1)

    @pl.when(j == 0)
    def _():
        b1 = bias1_ref[0:1, :]
        gamma = bias1_ref[1:2, :]
        beta = bias1_ref[2:3, :]
        # Linear 1 (MXU; reduced-precision operands, f32 accumulation).
        # Emphasis constant is already folded into W1 by the wrapper.
        h = jnp.dot(ctx_ref[...], w1_ref[...],
                    preferred_element_type=jnp.float32) + b1        # (TB, H)
        # LayerNorm, one-pass stats (biased variance, PyTorch default), f32.
        mu = jnp.mean(h, axis=-1, keepdims=True)
        var = jnp.maximum(jnp.mean(h * h, axis=-1, keepdims=True) - mu * mu, 0.0)
        h = (h - mu) * jax.lax.rsqrt(var + LN_EPS) * gamma + beta
        # ReLU, then park in VMEM scratch in the MXU operand dtype.
        h_ref[...] = jnp.maximum(h, 0.0).astype(h_ref.dtype)

    # Linear 2, one output-column tile (MXU).
    out = jnp.dot(h_ref[...], w2_ref[...],
                  preferred_element_type=jnp.float32) + b2_ref[...]
    out_ref[...] = out.astype(out_ref.dtype)


def bert_contextualizer_head(context, keyword_embeds, params, *,
                             tb=None, mxu_dtype=jnp.bfloat16, out_dtype=None):
    """Post-BERT emphasis + MLP head in one pipelined Pallas kernel.

    context        : (B, H) float32   BERT [CLS] embeddings of texts
    keyword_embeds : (K, H) or None   BERT [CLS] embeddings of keywords
                     (only K matters: emphasis factor is exactly 1 + 1/K)
    params: dict with w1 (H,H), b1 (H,), gamma (H,), beta (H,), w2 (H,H), b2 (H,)
    out_dtype: pass jnp.bfloat16 to halve output HBM writeback if downstream
               can consume bf16 (default keeps the input dtype / f32).
    """
    B, H = context.shape
    K = 0 if keyword_embeds is None else keyword_embeds.shape[0]
    emphasis = 1.0 + (1.0 / K if K > 0 else 0.0)
    out_dtype = context.dtype if out_dtype is None else out_dtype

    # ---- batch tiling: >=2 tiles when B > 8 (megacore), tiles up to ~512 rows
    # for large batches, padding kept below one tile.
    if tb is None:
        n_target = 1 if B <= 8 else max(2, math.ceil(B / 512))
        tb = 8 * math.ceil(B / (8 * n_target))
    tb = max(8, 8 * math.ceil(tb / 8))
    b_pad = int(tb * pl.cdiv(B, tb))
    nb = b_pad // tb

    # ---- W2 output-column tiling: only in the small-batch (weight-DMA-bound)
    # regime; for larger batches W2 stays fully resident (fetched once).
    tn = H
    if b_pad <= 64:
        for parts in (4, 2):
            if H % (128 * parts) == 0:
                tn = H // parts
                break
    nn = H // tn

    # ---- operands: fold emphasis into W1, ship MXU operands in mxu_dtype.
    w1 = (params["w1"].astype(jnp.float32) * emphasis).astype(mxu_dtype)
    w2 = params["w2"].astype(mxu_dtype)
    bias1 = jnp.stack([params["b1"], params["gamma"], params["beta"]],
                      axis=0).astype(jnp.float32)                    # (3, H)
    b2 = params["b2"].astype(jnp.float32).reshape(1, H)              # (1, H)

    ctx = context.astype(mxu_dtype)          # cast before padding: 2B/elem DMA
    if b_pad != B:
        # Zero rows flow through LN/ReLU harmlessly and are sliced off below.
        ctx = jnp.pad(ctx, ((0, b_pad - B), (0, 0)))

    # ---- VMEM budget: 2 buffers per BlockSpec (Pallas double-buffers even
    # constant-index_map resident blocks) + scratch + compiler headroom,
    # capped at 48 MiB (v7x has only 64 MiB physical per-TC VMEM).
    mxu_sz = jnp.dtype(mxu_dtype).itemsize
    out_sz = jnp.dtype(out_dtype).itemsize
    vmem_bytes = (2 * tb * H * mxu_sz        # ctx tiles
                  + 2 * H * H * mxu_sz       # W1 (resident, still 2 buffers)
                  + 2 * 8 * H * 4            # bias pack (sublane-padded)
                  + 2 * H * tn * mxu_sz      # W2 column tile
                  + 2 * 8 * tn * 4           # b2 column tile
                  + 2 * tb * tn * out_sz     # out tiles
                  + tb * H * mxu_sz          # h scratch
                  + (4 << 20))               # compiler-internal headroom
    vmem_limit = int(min(max(vmem_bytes, 16 << 20), 48 << 20))

    out = pl.pallas_call(
        _head_kernel,
        out_shape=jax.ShapeDtypeStruct((b_pad, H), out_dtype),
        grid=(nb, nn),
        in_specs=[
            pl.BlockSpec((tb, H), lambda i, j: (i, 0)),   # context tile
            pl.BlockSpec((H, H), lambda i, j: (0, 0)),    # W1 resident
            pl.BlockSpec((3, H), lambda i, j: (0, 0)),    # b1 / gamma / beta
            pl.BlockSpec((H, tn), lambda i, j: (0, j)),   # W2 column tile
            pl.BlockSpec((1, tn), lambda i, j: (0, j)),   # b2 column tile
        ],
        out_specs=pl.BlockSpec((tb, tn), lambda i, j: (i, j)),
        scratch_shapes=[pltpu.VMEM((tb, H), mxu_dtype)],  # h, persists over j
        compiler_params=pltpu.CompilerParams(
            dimension_semantics=("parallel", "arbitrary"),  # megacore on batch
            vmem_limit_bytes=vmem_limit,
        ),
    )(ctx, w1, bias1, w2, b2)
    return out[:B]


def init_params(key, hidden):
    k1, k2, k3, k4 = jax.random.split(key, 4)
    scale = 1.0 / jnp.sqrt(hidden)
    return {
        "w1": jax.random.uniform(k1, (hidden, hidden), jnp.float32, -scale, scale),
        "b1": jax.random.uniform(k2, (hidden,), jnp.float32, -scale, scale),
        "gamma": jnp.ones((hidden,), jnp.float32),
        "beta": jnp.zeros((hidden,), jnp.float32),
        "w2": jax.random.uniform(k3, (hidden, hidden), jnp.float32, -scale, scale),
        "b2": jax.random.uniform(k4, (hidden,), jnp.float32, -scale, scale),
    }


def _reference(context, keyword_embeds, params):
    """Pure-JAX reference mirroring the PyTorch forward (post-BERT, un-folded).

    Kept deliberately un-folded as the guard for the 1 + 1/K emphasis fold.
    """
    ctx = context
    if keyword_embeds is not None and keyword_embeds.shape[0] > 0:
        H = context.shape[-1]
        att = context @ keyword_embeds.T / jnp.sqrt(jnp.float32(H))
        emphasis = jax.nn.softmax(att, axis=-1).mean(axis=-1, keepdims=True)
        ctx = context * (1.0 + emphasis)
    h = ctx @ params["w1"] + params["b1"]
    mu = h.mean(-1, keepdims=True)
    var = ((h - mu) ** 2).mean(-1, keepdims=True)
    h = (h - mu) / jnp.sqrt(var + LN_EPS) * params["gamma"] + params["beta"]
    h = jnp.maximum(h, 0.0)
    return h @ params["w2"] + params["b2"]


if __name__ == "__main__":
    # BERT [CLS] outputs synthesized as deterministic random inputs.
    B, K, H = 16, 4, 256  # batch of texts, num emotional keywords, hidden size
    key = jax.random.PRNGKey(0)
    k_ctx, k_kw, k_p, k_ctx2 = jax.random.split(key, 4)
    context = jax.random.normal(k_ctx, (B, H), jnp.float32)
    keyword_embeds = jax.random.normal(k_kw, (K, H), jnp.float32)
    params = init_params(k_p, H)

    ref = _reference(context, keyword_embeds, params)

    # 1) f32 MXU path, small batch -> auto tiling gives grid=(2, 2): batch
    #    split across TCs + W2 column tiling (DMA/compute overlap). Tight check.
    out_f32 = bert_contextualizer_head(context, keyword_embeds, params,
                                       mxu_dtype=jnp.float32)
    out_f32 = jax.block_until_ready(out_f32)
    assert out_f32.shape == (B, H)
    assert jnp.allclose(out_f32, ref, atol=5e-4, rtol=5e-4), "f32 mismatch vs reference"

    # 2) bf16 operands + bf16 writeback (halved HBM traffic both ways);
    #    looser tolerance for the reduced-precision path.
    out_bf16 = bert_contextualizer_head(context, keyword_embeds, params,
                                        mxu_dtype=jnp.bfloat16,
                                        out_dtype=jnp.bfloat16)
    out_bf16 = jax.block_until_ready(out_bf16)
    assert out_bf16.shape == (B, H) and out_bf16.dtype == jnp.bfloat16
    rel_err = (jnp.max(jnp.abs(out_bf16.astype(jnp.float32) - ref))
               / (jnp.max(jnp.abs(ref)) + 1e-8))
    assert rel_err < 5e-2, f"bf16 path rel err too large: {rel_err}"

    # 3) Larger batch (B=72 > 64) -> resident-W2 path (grid=(2, 1)) with zero
    #    padding of the last batch tile; exercises padding + residency.
    B2 = 72
    context2 = jax.random.normal(k_ctx2, (B2, H), jnp.float32)
    ref2 = _reference(context2, keyword_embeds, params)
    out2 = bert_contextualizer_head(context2, keyword_embeds, params,
                                    mxu_dtype=jnp.float32)
    out2 = jax.block_until_ready(out2)
    assert out2.shape == (B2, H)
    assert jnp.allclose(out2, ref2, atol=5e-4, rtol=5e-4), "padded-batch mismatch"

    print("KERNEL_OK")
</pallas_src>

<mosaic_0001>
module attributes {stable_mosaic.version = 11 : i64} {
  func.func @_head_kernel(%arg0: i32, %arg1: i32, %arg2: memref<8x256xf32, #tpu.memory_space<vmem>>, %arg3: memref<256x256xf32, #tpu.memory_space<vmem>>, %arg4: memref<3x256xf32, #tpu.memory_space<vmem>>, %arg5: memref<256x128xf32, #tpu.memory_space<vmem>>, %arg6: memref<1x128xf32, #tpu.memory_space<vmem>>, %arg7: memref<8x128xf32, #tpu.memory_space<vmem>>, %arg8: memref<8x256xf32, #tpu.memory_space<vmem>>) attributes {dimension_semantics = [#tpu.dimension_semantics<parallel>, #tpu.dimension_semantics<arbitrary>], iteration_bounds = array<i64: 2, 2>, scalar_prefetch = 0 : i64, scratch_operands = 1 : i64, tpu.core_type = #tpu.core_type<tc>, window_params = [{transform_indices = @transform_0, window_bounds = array<i64: 8, 256>}, {pipeline_mode = #tpu.pipeline_mode<synchronous>, transform_indices = @transform_1, window_bounds = array<i64: 256, 256>}, {pipeline_mode = #tpu.pipeline_mode<synchronous>, transform_indices = @transform_2, window_bounds = array<i64: 3, 256>}, {transform_indices = @transform_3, window_bounds = array<i64: 256, 128>}, {transform_indices = @transform_4, window_bounds = array<i64: 1, 128>}, {transform_indices = @transform_5, window_bounds = array<i64: 8, 128>}]} {
    %c0_i32 = arith.constant 0 : i32
    %0 = arith.cmpi eq, %arg1, %c0_i32 : i32
    %1 = arith.extui %0 : i1 to i32
    %c0_i32_0 = arith.constant 0 : i32
    %2 = arith.cmpi ne, %1, %c0_i32_0 : i32
    scf.if %2 {
      %c0_8 = arith.constant 0 : index
      %c0_9 = arith.constant 0 : index
      %10 = vector.load %arg4[%c0_8, %c0_9] : memref<3x256xf32, #tpu.memory_space<vmem>>, vector<1x256xf32>
      %c1 = arith.constant 1 : index
      %c0_10 = arith.constant 0 : index
      %11 = vector.load %arg4[%c1, %c0_10] : memref<3x256xf32, #tpu.memory_space<vmem>>, vector<1x256xf32>
      %c2 = arith.constant 2 : index
      %c0_11 = arith.constant 0 : index
      %12 = vector.load %arg4[%c2, %c0_11] : memref<3x256xf32, #tpu.memory_space<vmem>>, vector<1x256xf32>
      %c0_12 = arith.constant 0 : index
      %c0_13 = arith.constant 0 : index
      %13 = vector.load %arg2[%c0_12, %c0_13] : memref<8x256xf32, #tpu.memory_space<vmem>>, vector<8x256xf32>
      %c0_14 = arith.constant 0 : index
      %c0_15 = arith.constant 0 : index
      %14 = vector.load %arg3[%c0_14, %c0_15] : memref<256x256xf32, #tpu.memory_space<vmem>>, vector<256x256xf32>
      %cst_16 = arith.constant dense<0.000000e+00> : vector<8x256xf32>
      %15 = tpu.matmul %13, %14, %cst_16 {dimension_numbers = #tpu.dot_dimension_numbers<[1], [0], [0], [1], [0, 0, 1, 1], [], []>} : vector<8x256xf32>, vector<256x256xf32>, vector<8x256xf32> -> vector<8x256xf32>
      %16 = vector.broadcast %10 : vector<1x256xf32> to vector<8x256xf32>
      %17 = arith.addf %15, %16 : vector<8x256xf32>
      %cst_17 = arith.constant dense<0.000000e+00> : vector<8xf32>
      %18 = vector.multi_reduction <add>, %17, %cst_17 [1] : vector<8x256xf32> to vector<8xf32>
      %19 = vector.shape_cast %18 : vector<8xf32> to vector<8x1xf32>
      %cst_18 = arith.constant 2.560000e+02 : f32
      %20 = vector.broadcast %cst_18 : f32 to vector<8x1xf32>
      %21 = arith.divf %19, %20 : vector<8x1xf32>
      %22 = arith.mulf %17, %17 : vector<8x256xf32>
      %cst_19 = arith.constant dense<0.000000e+00> : vector<8xf32>
      %23 = vector.multi_reduction <add>, %22, %cst_19 [1] : vector<8x256xf32> to vector<8xf32>
      %24 = vector.shape_cast %23 : vector<8xf32> to vector<8x1xf32>
      %cst_20 = arith.constant 2.560000e+02 : f32
      %25 = vector.broadcast %cst_20 : f32 to vector<8x1xf32>
      %26 = arith.divf %24, %25 : vector<8x1xf32>
      %27 = arith.mulf %21, %21 : vector<8x1xf32>
      %28 = arith.subf %26, %27 : vector<8x1xf32>
      %cst_21 = arith.constant 0.000000e+00 : f32
      %29 = vector.broadcast %cst_21 : f32 to vector<8x1xf32>
      %30 = arith.maximumf %28, %29 : vector<8x1xf32>
      %31 = vector.broadcast %21 : vector<8x1xf32> to vector<8x256xf32>
      %32 = arith.subf %17, %31 : vector<8x256xf32>
      %cst_22 = arith.constant 9.99999974E-6 : f32
      %33 = vector.broadcast %cst_22 : f32 to vector<8x1xf32>
      %34 = arith.addf %30, %33 : vector<8x1xf32>
      %35 = math.rsqrt %34 : vector<8x1xf32>
      %36 = vector.broadcast %35 : vector<8x1xf32> to vector<8x256xf32>
      %37 = arith.mulf %32, %36 : vector<8x256xf32>
      %38 = vector.broadcast %11 : vector<1x256xf32> to vector<8x256xf32>
      %39 = arith.mulf %37, %38 : vector<8x256xf32>
      %40 = vector.broadcast %12 : vector<1x256xf32> to vector<8x256xf32>
      %41 = arith.addf %39, %40 : vector<8x256xf32>
      %cst_23 = arith.constant 0.000000e+00 : f32
      %42 = vector.broadcast %cst_23 : f32 to vector<8x256xf32>
      %43 = arith.maximumf %41, %42 : vector<8x256xf32>
      %c0_24 = arith.constant 0 : index
      %c0_25 = arith.constant 0 : index
      %44 = vector.load %arg8[%c0_24, %c0_25] : memref<8x256xf32, #tpu.memory_space<vmem>>, vector<8x256xf32>
      tpu.vector_store %arg8[%c0_24, %c0_25], %43 {strides = array<i32>} : memref<8x256xf32, #tpu.memory_space<vmem>>, vector<8x256xf32>,
    } else {
    }
    %c0 = arith.constant 0 : index
    %c0_1 = arith.constant 0 : index
    %3 = vector.load %arg8[%c0, %c0_1] : memref<8x256xf32, #tpu.memory_space<vmem>>, vector<8x256xf32>
    %c0_2 = arith.constant 0 : index
    %c0_3 = arith.constant 0 : index
    %4 = vector.load %arg5[%c0_2, %c0_3] : memref<256x128xf32, #tpu.memory_space<vmem>>, vector<256x128xf32>
    %cst = arith.constant dense<0.000000e+00> : vector<8x128xf32>
    %5 = tpu.matmul %3, %4, %cst {dimension_numbers = #tpu.dot_dimension_numbers<[1], [0], [0], [1], [0, 0, 1, 1], [], []>} : vector<8x256xf32>, vector<256x128xf32>, vector<8x128xf32> -> vector<8x128xf32>
    %c0_4 = arith.constant 0 : index
    %c0_5 = arith.constant 0 : index
    %6 = vector.load %arg6[%c0_4, %c0_5] : memref<1x128xf32, #tpu.memory_space<vmem>>, vector<1x128xf32>
    %7 = vector.broadcast %6 : vector<1x128xf32> to vector<8x128xf32>
    %8 = arith.addf %5, %7 : vector<8x128xf32>
    %c0_6 = arith.constant 0 : index
    %c0_7 = arith.constant 0 : index
    %9 = vector.load %arg7[%c0_6, %c0_7] : memref<8x128xf32, #tpu.memory_space<vmem>>, vector<8x128xf32>
    tpu.vector_store %arg7[%c0_6, %c0_7], %8 {strides = array<i32>} : memref<8x128xf32, #tpu.memory_space<vmem>>, vector<8x128xf32>,
    return
  }
  func.func @transform_0(%arg0: i32, %arg1: i32) -> (i32, i32) {
    %c0_i32 = arith.constant 0 : i32
    %c0_i32_0 = arith.constant 0 : i32
    return %arg0, %c0_i32 : i32, i32
  }
  func.func @transform_1(%arg0: i32, %arg1: i32) -> (i32, i32) {
    %c0_i32 = arith.constant 0 : i32
    %c0_i32_0 = arith.constant 0 : i32
    %c0_i32_1 = arith.constant 0 : i32
    return %c0_i32, %c0_i32_0 : i32, i32
  }
  func.func @transform_2(%arg0: i32, %arg1: i32) -> (i32, i32) {
    %c0_i32 = arith.constant 0 : i32
    %c0_i32_0 = arith.constant 0 : i32
    %c0_i32_1 = arith.constant 0 : i32
    return %c0_i32, %c0_i32_0 : i32, i32
  }
  func.func @transform_3(%arg0: i32, %arg1: i32) -> (i32, i32) {
    %c0_i32 = arith.constant 0 : i32
    %c0_i32_0 = arith.constant 0 : i32
    return %c0_i32, %arg1 : i32, i32
  }
  func.func @transform_4(%arg0: i32, %arg1: i32) -> (i32, i32) {
    %c0_i32 = arith.constant 0 : i32
    %c0_i32_0 = arith.constant 0 : i32
    return %c0_i32, %arg1 : i32, i32
  }
  func.func @transform_5(%arg0: i32, %arg1: i32) -> (i32, i32) {
    %c0_i32 = arith.constant 0 : i32
    return %arg0, %arg1 : i32, i32
  }
}

</mosaic_0001>

<bundles_post_ra>
// kernel: tpu_custom_call.1
= control target key start
LH: loop header
LB: loop body
LE: loop exit
PB: predicated region body
PF: predicated region fallthrough
CT: control target
= control target key end

     0   :  { %s1889_s0 = inlined_call_operand.hbm [shape: f32[16,256], index: 0, kind: input, shape index: {}]   ;;  %s1890_s1 = inlined_call_operand.hbm [shape: f32[256,256], index: 1, kind: input, shape index: {}]   ;;  %s1891_s2 = inlined_call_operand.hbm [shape: f32[3,256], index: 2, kind: input, shape index: {}]   ;;  %s1892_s3 = inlined_call_operand.hbm [shape: f32[256,256], index: 3, kind: input, shape index: {}]   ;;  %s1893_s4 = inlined_call_operand.vmem [shape: f32[1,256], index: 4, kind: input, shape index: {}]   ;;  %s1894_s5 = inlined_call_operand.hbm [shape: f32[16,256], index: 5, kind: output, shape index: {}]  }
   0x1   :  { %1911 = sst [smem:[#allocation23_spill]] %s1889_s0 }
   0x2   :  { %1912 = sst [smem:[#allocation24_spill]] %s1890_s1 }
   0x3   :  { %1913 = sst [smem:[#allocation25_spill]] %s1891_s2 }
   0x4   :  { %1914 = sst [smem:[#allocation26_spill]] %s1892_s3 }
   0x5   :  { %1915 = sst [smem:[#allocation27_spill]] %s1893_s4 }
   0x6   :  { %1916 = sst [smem:[#allocation28_spill]] %s1894_s5 }
   0x7   :  { %10 = vsyncpa [#allocation4], 0 }
   0x8   :  { %12 = vsyncpa [#allocation4 + $0x1], 0 }
   0x9   :  { %13 = vsyncpa [#allocation7], 0 }
   0xa   :  { %14 = vsyncpa [#allocation10], 0 }
   0xb   :  { %16 = vsyncpa [#allocation10 + $0x1], 0 }
   0xc   :  { %17 = vsyncpa [#allocation5], 0 }
   0xd   :  { %19 = vsyncpa [#allocation5 + $0x1], 0  ;;  %s1429_s18 = smov 0   ;;  %s1431_s19 = smov 0  }
   0xe   :  { %s1433_s20 = smov 0   ;;  %s1435_s21 = smov 0  }
   0xf   :  { %s1437_s22 = smov 0   ;;  %s1439_s23 = smov 0  }
  0x10   :  { %s1441_s24 = smov 0   ;;  %s1443_s25 = smov 0  }
  0x11   :  { %s1445_s26 = smov 0   ;;  %s1447_s27 = smov 0  }
  0x12   :  { %s1449_s28 = smov 0   ;;  %s1451_s29 = smov 0  }
  0x13   :  { %s1453_s30 = smov 0   ;;  %s1455_s6 = smov 0  }
  0x14 LB: > { %1917 = sst [smem:[#allocation16_spill]] %s1336_s18  ;;  %s804_s7 = sadd.s32 4294967295, %s1388_s6   ;;  %s1388_s6 = sphi %s1455_s6, %s25_s6   ;;  %s1384_s30 = sphi %s1453_s30, %s1973_s30   ;;  %s1380_s29 = sphi %s1451_s29, %s1972_s29   ;;  %s1376_s28 = sphi %s1449_s28, %s1971_s28   ;;  %s1372_s27 = sphi %s1447_s27, %s1970_s27   ;;  %s1368_s26 = sphi %s1445_s26, %s1969_s26   ;;  %s1364_s25 = sphi %s1443_s25, %s1968_s25   ;;  %s1360_s24 = sphi %s1441_s24, %s1967_s24   ;;  %s1356_s23 = sphi %s1439_s23, %s1966_s23   ;;  %s1352_s22 = sphi %s1437_s22, %s1965_s22   ;;  %s1348_s21 = sphi %s1435_s21, %s1964_s21   ;;  %s1344_s20 = sphi %s1433_s20, %s1963_s20   ;;  %s1340_s19 = sphi %s1431_s19, %s1962_s19   ;;  %s1336_s18 = sphi %s1429_s18, %s1961_s18  }
  0x15   : > { %1918 = sst [smem:[#allocation17_spill]] %s1372_s27  ;;  %s805_s8 = sadd.s32 4294967294, %s1388_s6  }
  0x16   : > { %1919 = sst [smem:[#allocation18_spill]] %s1376_s28  ;;  %p1499_p0 = scmp.eq.s32.totalorder %s804_s7, 0 }
  0x17   : > { %p125_p1 = scmp.ne.s32.totalorder %s1352_s22, %s1348_s21  ;;  %p176_p2 = scmp.ne.s32.totalorder %s1344_s20, %s1340_s19 }
  0x18   : > { %s1920_s9 = scalar_select %p1499_p0, 1, 0 }
  0x19   : > { %p177_p3 = scmp.eq.s32.totalorder %s804_s7, 3  ;;  %p1508_p4 = por %p125_p1, %p1499_p0 }
  0x1a   : > { %p182_p5 = scmp.ne.s32.totalorder %s1340_s19, %s1336_s18  ;;  %p183_p7 = scmp.eq.s32.totalorder %s805_s8, 3 }
  0x1b   : > { %s1921_s10 = scalar_select %p1508_p4, 1, 0 }
  0x1c   : > { %p1514_p6 = por %p177_p3, %p176_p2  ;;  %p806_p8 = scmp.ge.s32.totalorder %s1388_s6, 1 }
  0x1d   : > { %p190_p9 = scmp.lt.s32.totalorder %s1388_s6, 5  ;;  %p1520_p10 = por %p183_p7, %p182_p5 }
  0x1e   : > { %s1922_s11 = scalar_select %p1514_p6, 1, 0 }
  0x1f   : > { %s1924_s12 = scalar_select %p1520_p10, 1, 0 }
  0x20   : > { %1923 = sst [smem:[#allocation19_spill]] %s1922_s11  ;;  %p1524_p11 = pnand %p806_p8, %p190_p9 }
  0x21   : > { %1925 = sst [smem:[#allocation20_spill]] %s1924_s12  ;;  %s1390_s14 = smov [#allocation6]  }
  0x22   : > { %s1926_s13 = scalar_select %p1524_p11, 1, 0 }
  0x23   : > { %s202_s15 = sshll.u32 %s1390_s14, 4  ;;  %p974_p12 = pneg %p1524_p11  ;;  %s203_s15 = int_to_ptr.vmem [resolvable:$true] %s202_s15 }
  0x24   : > { %s1391_s17 = smov [#allocation8]   ;;  %s1928_s1 = sld [smem:[#allocation24_spill]] }
  0x25   : > { %p1532_p13 = pnand %p974_p12, %p1499_p0  ;;  %s216_s21 = sshll.u32 %s1391_s17, 4  ;;  %s1536_s21 = int_to_ptr.vmem [resolvable:$true] %s216_s21 }
  0x27   : > { %p1120_p2 = pneg %p1532_p13 }
  0x2a   : > { %s1118_s12 = scalar_lea.hbm %s1928_s1, 8192 }
  0x2b   : > { %p1119_p1 = scmp.ne.s32.totalorder %s1928_s1, %s1118_s12  ;;  %p1125_p7 = scmp.lt.u32.totalorder %s1118_s12, %s1928_s1 }
  0x2d   : > { %p1121_p3 = pnand %p1120_p2, %p1119_p1 }
  0x2f   : > { %p1122_p5 = pneg %p1121_p3 }
  0x31   : > { %p1127_p8 = pnand %p1125_p7, %p1122_p5 }
  0x33   : > { %1130 = shalt.err (!%p1127_p8)
}
  0x34   : > { %s1131_s17 = scalar_lea.vmem %s203_s15, 8192  ;;  %p1139_p6 = scmp.lt.s32.totalorder %s203_s15, %s203_s15 }
  0x35   : > { %p1132_p9 = scmp.ne.s32.totalorder %s203_s15, %s1131_s17  ;;  %p1140_p4 = scmp.lt.s32.totalorder %s1131_s17, %s1131_s17 }
  0x37   : > { %p1134_p12 = pnand %p1132_p9, %p1120_p2  ;;  %p1141_p11 = por %p1140_p4, %p1139_p6 }
  0x39   : > { %p1135_p10 = pneg %p1134_p12 }
  0x3b   : > { %p1142_p0 = pnand %p1141_p11, %p1135_p10 }
  0x3d   : > { %1145 = shalt.err (!%p1142_p0)
}
  0x3e   : > { %s1906_s18 = smov 256   ;;  %s1393_s7 = smov 16  }
  0x3f   : > { %977 = dma.hbm_to_vmem [thread:$0]  (!%p1532_p13), %s1928_s1, 8192, %s203_s15, [#allocation7], %s1906_s18, %s1906_s18, %s1393_s7  }
  0x40   : > { %s1929_s2 = sld [smem:[#allocation25_spill]] }
  0x46   : > { %s1146_s14 = scalar_lea.hbm %s1929_s2, 128 }
  0x47   : > { %p1147_p4 = scmp.ne.s32.totalorder %s1929_s2, %s1146_s14  ;;  %p1153_p10 = scmp.lt.u32.totalorder %s1146_s14, %s1929_s2 }
  0x49   : > { %p1149_p0 = pnand %p1147_p4, %p1120_p2 }
  0x4b   : > { %p1150_p6 = pneg %p1149_p0 }
  0x4d   : > { %p1155_p11 = pnand %p1153_p10, %p1150_p6 }
  0x4f   : > { %1158 = shalt.err (!%p1155_p11)
}
  0x50   : > { %s1159_s15 = scalar_lea.vmem %s1536_s21, 128  ;;  %p1167_p7 = scmp.lt.s32.totalorder %s1536_s21, %s1536_s21 }
  0x51   : > { %p1160_p1 = scmp.ne.s32.totalorder %s1536_s21, %s1159_s15  ;;  %p1168_p8 = scmp.lt.s32.totalorder %s1159_s15, %s1159_s15 }
  0x53   : > { %p1162_p3 = pnand %p1160_p1, %p1120_p2  ;;  %p1169_p9 = por %p1168_p8, %p1167_p7 }
  0x55   : > { %p1163_p5 = pneg %p1162_p3 }
  0x57   : > { %p1170_p12 = pnand %p1169_p9, %p1163_p5 }
  0x59   : > { %1173 = shalt.err (!%p1170_p12)
}
  0x5a   : > { %980 = dma.hbm_to_vmem [thread:$0]  (!%p1532_p13), %s1929_s2, 128, %s1536_s21, [#allocation7]  }
  0x5b   : > { %s34_s28 = sadd.s32 1, %s1380_s29  ;;  %s37_s16 = sadd.s32 1, %s1384_s30 }
  0x5c   : > { %p35_p2 = scmp.ge.s32.totalorder %s34_s28, 2  ;;  %s44_s7 = sadd.s32 1, %s1368_s26 }
  0x5d   : > { %p51_p4 = scmp.ne.s32.totalorder %s1368_s26, %s1364_s25  ;;  %p52_p0 = scmp.eq.s32.totalorder %s1388_s6, 0 }
  0x5e   : > { %s1975_s28 = smov (%p35_p2, %s34_s28), 0  ;;  %s1977_s16 = smov (!%p35_p2, %s37_s16), %s1384_s30 }
  0x5f   : > { %1930 = sst [smem:[#allocation21_spill]] %s1975_s28  ;;  %p57_p6 = scmp.ne.s32.totalorder %s1364_s25, %s1360_s24 }
  0x60   : > { %p39_p13 = scmp.ge.s32.totalorder %s1977_s16, 2  ;;  %s109_s21 = ssub.s32 %s1380_s29, %s1975_s28 }
  0x61   : > { %p1602_p10 = por %p52_p0, %p51_p4  ;;  %p1932_p11 = scmp.ne.s32.totalorder %s1920_s9, 0 }
  0x62   : > { %s1979_s16 = smov (%p39_p13, %s1977_s16), 0  ;;  %p110_p3 = scmp.eq.s32.totalorder %s109_s21, 0 }
  0x63   : > { %p1608_p1 = por %p1932_p11, %p57_p6  ;;  %1934 = sst [smem:[#allocation22_spill]] %s1979_s16 }
  0x64   : > { %s112_s24 = sadd.s32 1, %s1356_s23  ;;  %s41_s12 = ssub.s32 %s1384_s30, %s1979_s16 }
  0x65   : > { %s1933_s11 = scalar_select %p1608_p1, 1, 0 }
  0x66   : > { %p119_p5 = scmp.ne.s32.totalorder %s1356_s23, %s1352_s22  ;;  %p42_p7 = scmp.eq.s32.totalorder %s41_s12, 0 }
  0x67   : > { %s163_s8 = sor.u32 %s109_s21, %s41_s12  ;;  %s166_s4 = sadd.s32 1, %s1344_s20 }
  0x68   : > { %s1620_s14 = scalar_select %p110_p3, %s1356_s23, %s112_s24  }
  0x69   : > { %s1623_s17 = scalar_select %p42_p7, %s1368_s26, %s44_s7  }
  0x6a   : > { %p1627_p8 = por %p119_p5, %p52_p0  ;;  %p164_p9 = scmp.eq.s32.totalorder %s163_s8, 0 }
  0x6b   : > { %p994_p12 = scmp.lt.s32.totalorder %s1388_s6, 4  ;;  %s227_s18 = sand.u32 1, %s1368_s26  }
  0x6c   : > { %s1634_s27 = scalar_select %p164_p9, %s1344_s20, %s166_s4  }
  0x6d   : > { %s828_s1 = sshll.u32 %s1384_s30, 8  ;;  %s810_s2 = sshll.u32 %s227_s18, 4 }
  0x6e   : > { %s1936_s0 = sld [smem:[#allocation23_spill]]  ;;  %s231_s7 = scalar_lea.vmem [#allocation3], %s810_s2 }
  0x6f   : > { %s239_s16 = sshll.u32 %s231_s7, 4  ;;  %p1645_p2 = pnand %p994_p12, %p1602_p10  ;;  %s1649_s16 = int_to_ptr.vmem [resolvable:$true] %s239_s16 }
  0x70   : > { %p1653_p4 = pnand %p994_p12, %p1627_p8  ;;  %s228_s21 = scalar_lea.sflag [#allocation4], %s227_s18 }
  0x71   : > { %p1176_p6 = pneg %p1645_p2 }
  0x74   : > { %s1641_s12 = scalar_lea.hbm %s1936_s0, %s828_s1  ;;  %s246_s1 = sand.u32 1, %s1356_s23  }
  0x75   : > { %s1174_s24 = scalar_lea.hbm %s1641_s12, 256  ;;  %s1179_s7 = scalar_lea.hbm %s1936_s0, 512 }
  0x76   : > { %p1175_p0 = scmp.ne.s32.totalorder %s1641_s12, %s1174_s24  ;;  %p1180_p11 = scmp.lt.u32.totalorder %s1641_s12, %s1936_s0 }
  0x77   : > { %p1181_p3 = scmp.lt.u32.totalorder %s1179_s7, %s1174_s24  ;;  %p1183_p7 = scmp.lt.u32.totalorder %s1174_s24, %s1641_s12 }
  0x78   : > { %p1177_p13 = pnand %p1176_p6, %p1175_p0 }
  0x79   : > { %p1182_p5 = por %p1181_p3, %p1180_p11 }
  0x7a   : > { %p1178_p10 = pneg %p1177_p13 }
  0x7b   : > { %p1184_p8 = por %p1183_p7, %p1182_p5 }
  0x7d   : > { %p1185_p9 = pnand %p1184_p8, %p1178_p10 }
  0x7f   : > { %1188 = shalt.err (!%p1185_p9)
}
  0x80   : > { %s1189_s18 = scalar_lea.vmem %s1649_s16, 256  ;;  %s1394_s2 = smov [#allocation3]  }
  0x81   : > { %p1190_p12 = scmp.ne.s32.totalorder %s1649_s16, %s1189_s18  ;;  %s1194_s5 = sshll.u32 %s1394_s2, 4  ;;  %s1195_s5 = int_to_ptr.vmem [resolvable:$false] %s1194_s5 }
  0x82   : > { %s1196_s28 = scalar_lea.vmem %s1195_s5, 512  ;;  %p1197_p1 = scmp.lt.s32.totalorder %s1649_s16, %s1195_s5 }
  0x83   : > { %p1192_p0 = pnand %p1190_p12, %p1176_p6  ;;  %p1198_p11 = scmp.lt.s32.totalorder %s1196_s28, %s1189_s18 }
  0x85   : > { %p1193_p13 = pneg %p1192_p0  ;;  %p1199_p3 = por %p1198_p11, %p1197_p1 }
  0x87   : > { %p1200_p5 = pnand %p1199_p3, %p1193_p13 }
  0x89   : > { %1203 = shalt.err (!%p1200_p5)
}
  0x8a   : > { %984 = dma.hbm_to_vmem [thread:$0]  (!%p1645_p2), %s1641_s12, 256, %s1649_s16, %s228_s21  }
  0x8b   : > { %s813_s24 = sshll.u32 %s246_s1, 8  ;;  %s814_s7 = sshll.u32 %s1380_s29, 7 }
  0x8c   : > { %s1939_s3 = sld [smem:[#allocation26_spill]]  ;;  %s250_s8 = scalar_lea.vmem [#allocation9], %s813_s24 }
  0x8d   : > { %s256_s5 = sshll.u32 %s250_s8, 4  ;;  %s1695_s28 = scalar_lea.sflag [#allocation10], %s246_s1  ;;  %s1691_s5 = int_to_ptr.vmem [resolvable:$true] %s256_s5 }
  0x8e   : > { %p1206_p2 = pneg %p1653_p4 }
  0x92   : > { %s1689_s18 = scalar_lea.hbm %s1939_s3, %s814_s7  ;;  %s1209_s7 = scalar_lea.hbm %s1939_s3, 8192 }
  0x93   : > { %s1204_s16 = scalar_lea.hbm %s1689_s18, 4096  ;;  %p1210_p7 = scmp.lt.u32.totalorder %s1689_s18, %s1939_s3 }
  0x94   : > { %p1205_p1 = scmp.ne.s32.totalorder %s1689_s18, %s1204_s16  ;;  %p1211_p8 = scmp.lt.u32.totalorder %s1209_s7, %s1204_s16 }
  0x95   : > { %p1213_p12 = scmp.lt.u32.totalorder %s1204_s16, %s1689_s18 }
  0x96   : > { %p1207_p6 = pnand %p1206_p2, %p1205_p1  ;;  %p1212_p9 = por %p1211_p8, %p1210_p7 }
  0x98   : > { %p1208_p10 = pneg %p1207_p6  ;;  %p1214_p0 = por %p1213_p12, %p1212_p9 }
  0x9a   : > { %p1215_p13 = pnand %p1214_p0, %p1208_p10 }
  0x9c   : > { %1218 = shalt.err (!%p1215_p13)
}
  0x9d   : > { %s1219_s1 = scalar_lea.vmem %s1691_s5, 4096  ;;  %s1395_s2 = smov [#allocation9]  }
  0x9e   : > { %p1220_p11 = scmp.ne.s32.totalorder %s1691_s5, %s1219_s1  ;;  %s1224_s8 = sshll.u32 %s1395_s2, 4  ;;  %s1225_s8 = int_to_ptr.vmem [resolvable:$false] %s1224_s8 }
  0x9f   : > { %s1226_s12 = scalar_lea.vmem %s1225_s8, 8192  ;;  %p1227_p1 = scmp.lt.s32.totalorder %s1691_s5, %s1225_s8 }
  0xa0   : > { %p1222_p3 = pnand %p1220_p11, %p1206_p2  ;;  %p1228_p6 = scmp.lt.s32.totalorder %s1226_s12, %s1219_s1 }
  0xa2   : > { %p1223_p5 = pneg %p1222_p3  ;;  %p1229_p7 = por %p1228_p6, %p1227_p1 }
  0xa4   : > { %p1230_p8 = pnand %p1229_p7, %p1223_p5 }
  0xa6   : > { %1233 = shalt.err (!%p1230_p8)
}
  0xa7   : > { %s1396_s16 = smov 128   ;;  %s1397_s21 = smov 8  }
  0xa8   : > { %s1940_s7 = smov 256   ;;  %p1941_p2 = scmp.ne.s32.totalorder %s1926_s13, 0 }
  0xa9   : > { %987 = dma.hbm_to_vmem [thread:$0]  (!%p1653_p4), %s1689_s18, 4096, %s1691_s5, %s1695_s28, %s1940_s7, %s1396_s16, %s1397_s21  }
  0xaa   : > { %274 = sbr.rel (%p1941_p2) target bundleno = 917 (0x395), region = 40  ;;  %s276_s15 = sand.u32 (!%p1941_p2), 1, %s1364_s25  }
  0xab   : > { %s1727_s24 = sshll.u32 (!%p1941_p2), %s276_s15, 4  ;;  %s277_s1 = scalar_lea.sflag (!%p1941_p2), [#allocation4], %s276_s15 }
  0xac   : > { %s280_s2 = scalar_lea.vmem (!%p1941_p2), [#allocation3], %s1727_s24  ;;  %p1942_p10 = scmp.ne.s32.totalorder (!%p1941_p2), %s1933_s11, 0 }
  0xb1   : > { %1319 = dma.done.wait (%p1942_p10), %s277_s1, 256  }
  0xb2   : > { %1321 = vsyncadd (%p1942_p10), %s277_s1, 4294967040  ;;  %p1943_p9 = scmp.ne.s32.totalorder %s1920_s9, 0 }
  0xb4   : > { %1323 = dma.done.wait (%p1943_p9), [#allocation7], 8320  }
  0xb5   : > { %1325 = vsyncadd (%p1943_p9), [#allocation7], 4294958976  ;;  %s293_s13 = sand.u32 1, %s1352_s22   ;;  %p1944_p4 = scmp.ne.s32.totalorder %s1921_s10, 0 }
  0xb6   : > { %s819_s4 = sshll.u32 %s293_s13, 8  ;;  %s294_s18 = scalar_lea.sflag [#allocation10], %s293_s13 }
  0xb7   : > { %s1739_s5 = scalar_lea.vmem [#allocation9], %s819_s4 }
  0xb8   : > { %1327 = dma.done.wait (%p1944_p4), %s294_s18, 4096  }
  0xb9   : > { %1329 = vsyncadd (%p1944_p4), %s294_s18, 4294963200  ;;  %s1945_s11 = sld [smem:[#allocation17_spill]]  ;;  %s1910_s28 = sand.u32 1, %s1340_s19  }
  0xba   : > { %s1749_s9 = sshll.u32 %s1910_s28, 3  ;;  %s1946_s21 = sld [smem:[#allocation27_spill]] }
  0xbb   : > { %s331_s15 = scalar_lea.vmem [#allocation11], %s1749_s9 }
  0xbf   : > { %p332_p12 = scmp.lt.s32.totalorder %s1945_s11, 1  ;;  %p821_p0 = scmp.ne.s32.totalorder %s1945_s11, 0 }
  0xc0   : > { %v347_v0 = vld [vmem:[#allocation6 + $0x8] sm:$0xff] (!%p821_p0)  ;;  %v349_v1 = vld [vmem:[#allocation6 + $0x18] sm:$0xff] (!%p821_p0)  ;;  %v346_v2 = vld [vmem:[#allocation6] sm:$0xff] (!%p821_p0) }
  0xc1   : > { %s1752_s8 = scalar_select %p332_p12, %s1945_s11, 1 }
  0xc2   : > { %338 = sbr.rel (%p821_p0) target bundleno = 651 (0x28b), region = 60  ;;  %v864_v3 = vpack.c.bf16 (!%p821_p0), %v349_v1, %v347_v0  ;;  %v348_v4 = vld [vmem:[#allocation6 + $0x10] sm:$0xff] (!%p821_p0)  ;;  %v351_v5 = vld [vmem:[#allocation6 + $0x28] sm:$0xff] (!%p821_p0)  ;;  %v353_v6 = vld [vmem:[#allocation6 + $0x38] sm:$0xff] (!%p821_p0) }
  0xc3   : > { %s334_s7 = scalar_lea.vmem %s1946_s21, %s1752_s8  ;;  %v866_v7 = vpack.c.bf16 (!%p821_p0), %v348_v4, %v346_v2  ;;  %v868_v8 = vpack.c.bf16 (!%p821_p0), %v353_v6, %v351_v5  ;;  %v350_v9 = vld [vmem:[#allocation6 + $0x20] sm:$0xff] (!%p821_p0)  ;;  %v352_v10 = vld [vmem:[#allocation6 + $0x30] sm:$0xff] (!%p821_p0)  ;;  %v355_v11 = vld [vmem:[#allocation6 + $0x48] sm:$0xff] (!%p821_p0) }
  0xc4   : > { %865 = vmatprep.subr.bf16.mxu0 (!%p821_p0), %v864_v3  ;;  %v357_v12 = vld [vmem:[#allocation6 + $0x58] sm:$0xff] (!%p821_p0)  ;;  %v870_v13 = vpack.c.bf16 (!%p821_p0), %v352_v10, %v350_v9  ;;  %v354_v15 = vld [vmem:[#allocation6 + $0x40] sm:$0xff] (!%p821_p0)  ;;  %v356_v16 = vld [vmem:[#allocation6 + $0x50] sm:$0xff] (!%p821_p0) }
  0xc5   : > { %867 = vmatpush1.bf16.msra.mxu0 (!%p821_p0), %v866_v7  ;;  %v872_v14 = vpack.c.bf16 (!%p821_p0), %v357_v12, %v355_v11  ;;  %v359_v17 = vld [vmem:[#allocation6 + $0x68] sm:$0xff] (!%p821_p0)  ;;  %v361_v18 = vld [vmem:[#allocation6 + $0x78] sm:$0xff] (!%p821_p0)  ;;  %v874_v19 = vpack.c.bf16 (!%p821_p0), %v356_v16, %v354_v15  ;;  %v358_v21 = vld [vmem:[#allocation6 + $0x60] sm:$0xff] (!%p821_p0) }
  0xc6   : > { %869 = vmatprep.subr.bf16.mxu0 (!%p821_p0), %v868_v8  ;;  %v876_v20 = vpack.c.bf16 (!%p821_p0), %v361_v18, %v359_v17  ;;  %v360_v22 = vld [vmem:[#allocation6 + $0x70] sm:$0xff] (!%p821_p0)  ;;  %v363_v23 = vld [vmem:[#allocation6 + $0x88] sm:$0xff] (!%p821_p0)  ;;  %v365_v24 = vld [vmem:[#allocation6 + $0x98] sm:$0xff] (!%p821_p0) }
  0xc7   : > { %v878_v25 = vpack.c.bf16 (!%p821_p0), %v360_v22, %v358_v21  ;;  %v880_v26 = vpack.c.bf16 (!%p821_p0), %v365_v24, %v363_v23  ;;  %v362_v27 = vld [vmem:[#allocation6 + $0x80] sm:$0xff] (!%p821_p0)  ;;  %v364_v28 = vld [vmem:[#allocation6 + $0x90] sm:$0xff] (!%p821_p0)  ;;  %v367_v29 = vld [vmem:[#allocation6 + $0xa8] sm:$0xff] (!%p821_p0) }
  0xc8   : > { %v369_v30 = vld [vmem:[#allocation6 + $0xb8] sm:$0xff] (!%p821_p0)  ;;  %v882_v31 = vpack.c.bf16 (!%p821_p0), %v364_v28, %v362_v27  ;;  %v366_v33 = vld [vmem:[#allocation6 + $0xa0] sm:$0xff] (!%p821_p0)  ;;  %v368_v34 = vld [vmem:[#allocation6 + $0xb0] sm:$0xff] (!%p821_p0) }
  0xc9   : > { %871 = vmatpush1.bf16.msra.mxu0 %v870_v13  ;;  %v884_v32 = vpack.c.bf16 %v369_v30, %v367_v29  ;;  %v371_v35 = vld [vmem:[#allocation6 + $0xc8] sm:$0xff]  ;;  %v373_v36 = vld [vmem:[#allocation6 + $0xd8] sm:$0xff]  ;;  %v886_v37 = vpack.c.bf16 %v368_v34, %v366_v33  ;;  %v370_v39 = vld [vmem:[#allocation6 + $0xc0] sm:$0xff]  ;;  %v411_v34 = vlaneseq }
  0xca   : > { %873 = vmatprep.subr.bf16.mxu0 %v872_v14  ;;  %v888_v38 = vpack.c.bf16 %v373_v36, %v371_v35  ;;  %v372_v40 = vld [vmem:[#allocation6 + $0xd0] sm:$0xff]  ;;  %v345_v41 = vld [vmem:[%s280_s2 + $0x8] sm:$0xff]  ;;  %v374_v46 = vld [vmem:[#allocation6 + $0xe0] sm:$0xff] }
  0xcb   : > { %v375_v42 = vld [vmem:[#allocation6 + $0xe8] sm:$0xff]  ;;  %v377_v43 = vld [vmem:[#allocation6 + $0xf8] sm:$0xff]  ;;  %485 = vmatprep.mubr.f32.mxu0 %v345_v41  ;;  %v890_v44 = vpack.c.bf16 %v372_v40, %v370_v39  ;;  %v376_v47 = vld [vmem:[#allocation6 + $0xf0] sm:$0xff]  ;;  %v412_v35 = vshrl.u32 %v411_v34, 7 }
  0xcc   : > { %v892_v45 = vpack.c.bf16 %v377_v43, %v375_v42  ;;  %v379_v48 = vld [vmem:[#allocation6 + $0x108] sm:$0xff]  ;;  %v381_v49 = vld [vmem:[#allocation6 + $0x118] sm:$0xff]  ;;  %v894_v50 = vpack.c.bf16 %v376_v47, %v374_v46  ;;  %v378_v52 = vld [vmem:[#allocation6 + $0x100] sm:$0xff] }
  0xcd   : > { %875 = vmatpush1.bf16.msra.mxu0 %v874_v19  ;;  %v896_v51 = vpack.c.bf16 %v381_v49, %v379_v48  ;;  %v380_v53 = vld [vmem:[#allocation6 + $0x110] sm:$0xff]  ;;  %v383_v54 = vld [vmem:[#allocation6 + $0x128] sm:$0xff]  ;;  %v385_v55 = vld [vmem:[#allocation6 + $0x138] sm:$0xff]  ;;  %v413_v36 = vsub.s32 0, %v412_v35 }
  0xce   : > { %877 = vmatprep.subr.bf16.mxu0 %v876_v20  ;;  %v898_v56 = vpack.c.bf16 %v380_v53, %v378_v52  ;;  %v900_v57 = vpack.c.bf16 %v385_v55, %v383_v54  ;;  %v382_v58 = vld [vmem:[#allocation6 + $0x120] sm:$0xff]  ;;  %v384_v59 = vld [vmem:[#allocation6 + $0x130] sm:$0xff]  ;;  %v387_v60 = vld [vmem:[#allocation6 + $0x148] sm:$0xff] }
  0xcf   : > { %v389_v61 = vld [vmem:[#allocation6 + $0x158] sm:$0xff]  ;;  %v902_v62 = vpack.c.bf16 %v384_v59, %v382_v58  ;;  %v386_v0 = vld [vmem:[#allocation6 + $0x140] sm:$0xff]  ;;  %v388_v1 = vld [vmem:[#allocation6 + $0x150] sm:$0xff] }
  0xd0   : > { %v904_v63 = vpack.c.bf16 %v389_v61, %v387_v60  ;;  %v391_v2 = vld [vmem:[#allocation6 + $0x168] sm:$0xff]  ;;  %v393_v3 = vld [vmem:[#allocation6 + $0x178] sm:$0xff]  ;;  %v906_v4 = vpack.c.bf16 %v388_v1, %v386_v0  ;;  %v390_v6 = vld [vmem:[#allocation6 + $0x160] sm:$0xff] }
  0xd1   : > { %879 = vmatpush1.bf16.msra.mxu0 %v878_v25  ;;  %v908_v5 = vpack.c.bf16 %v393_v3, %v391_v2  ;;  %v392_v7 = vld [vmem:[#allocation6 + $0x170] sm:$0xff]  ;;  %v395_v8 = vld [vmem:[#allocation6 + $0x188] sm:$0xff]  ;;  %v397_v9 = vld [vmem:[#allocation6 + $0x198] sm:$0xff] }
  0xd2   : > { %881 = vmatprep.subr.bf16.mxu0 %v880_v26  ;;  %v910_v10 = vpack.c.bf16 %v392_v7, %v390_v6  ;;  %v912_v11 = vpack.c.bf16 %v397_v9, %v395_v8  ;;  %v394_v12 = vld [vmem:[#allocation6 + $0x180] sm:$0xff]  ;;  %v396_v13 = vld [vmem:[#allocation6 + $0x190] sm:$0xff]  ;;  %v399_v14 = vld [vmem:[#allocation6 + $0x1a8] sm:$0xff] }
  0xd3   : > { %v401_v15 = vld [vmem:[#allocation6 + $0x1b8] sm:$0xff]  ;;  %v914_v16 = vpack.c.bf16 %v396_v13, %v394_v12  ;;  %v398_v18 = vld [vmem:[#allocation6 + $0x1a0] sm:$0xff]  ;;  %v400_v19 = vld [vmem:[#allocation6 + $0x1b0] sm:$0xff] }
  0xd4   : > { %v916_v17 = vpack.c.bf16 %v401_v15, %v399_v14  ;;  %v403_v20 = vld [vmem:[#allocation6 + $0x1c8] sm:$0xff]  ;;  %v405_v21 = vld [vmem:[#allocation6 + $0x1d8] sm:$0xff]  ;;  %v918_v22 = vpack.c.bf16 %v400_v19, %v398_v18  ;;  %v402_v24 = vld [vmem:[#allocation6 + $0x1c0] sm:$0xff] }
  0xd5   : > { %883 = vmatpush1.bf16.msra.mxu0 %v882_v31  ;;  %v920_v23 = vpack.c.bf16 %v405_v21, %v403_v20  ;;  %v404_v25 = vld [vmem:[#allocation6 + $0x1d0] sm:$0xff]  ;;  %v407_v26 = vld [vmem:[#allocation6 + $0x1e8] sm:$0xff]  ;;  %v409_v27 = vld [vmem:[#allocation6 + $0x1f8] sm:$0xff] }
  0xd6   : > { %885 = vmatprep.subr.bf16.mxu0 %v884_v32  ;;  %v922_v28 = vpack.c.bf16 %v404_v25, %v402_v24  ;;  %v924_v29 = vpack.c.bf16 %v409_v27, %v407_v26  ;;  %v406_v30 = vld [vmem:[#allocation6 + $0x1e0] sm:$0xff]  ;;  %v408_v31 = vld [vmem:[#allocation6 + $0x1f0] sm:$0xff] }
  0xd7   : > { %v926_v32 = vpack.c.bf16 %v408_v31, %v406_v30  ;;  %v344_v33 = vld [vmem:[%s280_s2] sm:$0xff] }
  0xd8   : > { %v343_v58 = vld [vmem:[#allocation8 + $0x2] ss:$4 sm:$0x3] }
  0xd9   : > { %887 = vmatpush1.bf16.msra.mxu0 %v886_v37  ;;  %v339_v37 = vld [vmem:[#allocation8] ss:$4 sm:$0x3]  ;;  %v529_v0 = vrot.slane %v343_v58, %v413_v36 }
  0xda   : > { %889 = vmatprep.subr.bf16.mxu0 %v888_v38  ;;  %v417_v38 = vsub.s32 1, %v412_v35  ;;  %v414_v39 = vrot.slane %v339_v37, %v413_v36 }
  0xdc   : > { %v418_v40 = vrot.slane %v339_v37, %v417_v38  ;;  %v533_v1 = vrot.slane %v343_v58, %v417_v38 }
  0xdd   : > { %891 = vmatpush1.bf16.msra.mxu0 %v890_v44 }
  0xde   : > { %893 = vmatprep.subr.bf16.mxu0 %v892_v45 }
  0xe1   : > { %895 = vmatpush1.bf16.msra.mxu0 %v894_v50 }
  0xe2   : > { %897 = vmatprep.subr.bf16.mxu0 %v896_v51 }
  0xe5   : > { %899 = vmatpush1.bf16.msra.mxu0 %v898_v56 }
  0xe6   : > { %901 = vmatprep.subr.bf16.mxu0 %v900_v57  ;;  %v341_v57 = vld [vmem:[#allocation8 + $0x1] ss:$4 sm:$0x3] }
  0xe7   : > { %v516_v59 = vrot.slane %v341_v57, %v413_v36  ;;  %v520_v60 = vrot.slane %v341_v57, %v417_v38 }
  0xe9   : > { %903 = vmatpush1.bf16.msra.mxu0 %v902_v62 }
  0xea   : > { %905 = vmatprep.subr.bf16.mxu0 %v904_v63 }
  0xed   : > { %907 = vmatpush1.bf16.msra.mxu0 %v906_v4 }
  0xee   : > { %909 = vmatprep.subr.bf16.mxu0 %v908_v5 }
  0xf1   : > { %911 = vmatpush1.bf16.msra.mxu0 %v910_v10 }
  0xf2   : > { %913 = vmatprep.subr.bf16.mxu0 %v912_v11 }
  0xf5   : > { %915 = vmatpush1.bf16.msra.mxu0 %v914_v16 }
  0xf6   : > { %917 = vmatprep.subr.bf16.mxu0 %v916_v17 }
  0xf9   : > { %919 = vmatpush1.bf16.msra.mxu0 %v918_v22 }
  0xfa   : > { %921 = vmatprep.subr.bf16.mxu0 %v920_v23 }
  0xfd   : > { %923 = vmatpush1.bf16.msra.mxu0 %v922_v28 }
  0xfe   : > { %925 = vmatprep.subr.bf16.mxu0 %v924_v29 }
 0x101   : > { %927 = vmatpush1.bf16.msra.mxu0 %v926_v32 }
 0x104   : > { %486 = vmatmul.mubr.f32.vlgmr.msra.gmra.mrb[0].mxu0 %v344_v33 }
 0x1d7   : > { %v487_v41 = vpop.f32.mrb[0].mxu0 }
 0x1d8   : > { %v488_v42 = vadd.f32 %v487_v41, %v414_v39  ;;  %v489_v43 = vpop.f32.mrb[1].mxu0 }
 0x1d9   : > { %v490_v44 = vadd.f32 %v489_v43, %v418_v40 }
 0x1da   : > { %v497_v46 = vmul.f32 %v488_v42, %v488_v42 }
 0x1db   : > { %v492_v45 = vadd.f32 %v490_v44, %v488_v42  ;;  %v498_v47 = vmul.f32 %v490_v44, %v490_v44 }
 0x1dd   : > { %493 = vadd.xlane.f32.xlu0 %v492_v45  ;;  %v499_v48 = vadd.f32 %v498_v47, %v497_v46 }
 0x1e1   : > { %500 = vadd.xlane.f32.xlu0 %v499_v48 }
 0x26a   : > { %v494_v49 = vpop.xlane.xlu0 %493 }
 0x26b   : > { %v496_v50 = vmul.f32 0.00390625, %v494_v49 }
 0x26d   : > { %v503_v52 = vmul.f32 %v496_v50, %v496_v50  ;;  %v506_v61 = vsub.f32 %v488_v42, %v496_v50  ;;  %v507_v62 = vsub.f32 %v490_v44, %v496_v50 }
 0x26e   : > { %v501_v51 = vpop.xlane.xlu0 %500 }
 0x26f   : > { %v502_v53 = vmul.f32 0.00390625, %v501_v51 }
 0x271   : > { %v504_v54 = vsub.f32 %v502_v53, %v503_v52 }
 0x273   : > { %v505_v55 = vmax.f32 %v504_v54, 0.0 }
 0x275   : > { %v508_v56 = vadd.f32 1e-05, %v505_v55 }
 0x277   : > { %1116 = vrsqrt.f32 %v508_v56 }
 0x281   : > { %v1117_v63 = vpop.eup %1116 }
 0x282   : > { %v510_v2 = vmul.f32 %v1117_v63, %v506_v61  ;;  %v511_v3 = vmul.f32 %v1117_v63, %v507_v62 }
 0x284   : > { %v523_v4 = vmul.f32 %v516_v59, %v510_v2  ;;  %v524_v5 = vmul.f32 %v520_v60, %v511_v3 }
 0x286   : > { %v536_v6 = vadd.f32 %v529_v0, %v523_v4  ;;  %v537_v7 = vadd.f32 %v533_v1, %v524_v5 }
 0x288   : > { %v538_v8 = vmax.f32 %v536_v6, 0.0  ;;  %v539_v9 = vmax.f32 %v537_v7, 0.0 }
 0x28a   : > { %540 = vst [vmem:[#allocation2] sm:$0xff] %v538_v8  ;;  %541 = vst [vmem:[#allocation2 + $0x8] sm:$0xff] %v539_v9 }
 0x28b PF: > { %v560_v10 = vld [vmem:[%s1739_s5 + $0x80] sm:$0xff]  ;;  %v561_v11 = vld [vmem:[%s1739_s5 + $0x88] sm:$0xff]  ;;  %v562_v15 = vld [vmem:[%s1739_s5 + $0x90] sm:$0xff]  ;;  %s1947_s10 = sld [smem:[#allocation18_spill]]  ;;  %s1948_s24 = sld [smem:[#allocation17_spill]] }
 0x28c   : > { %v544_v12 = vld [vmem:[%s1739_s5] sm:$0xff]  ;;  %v928_v13 = vpack.c.bf16 %v561_v11, %v560_v10  ;;  %v545_v14 = vld [vmem:[%s1739_s5 + $0x8] sm:$0xff]  ;;  %v563_v16 = vld [vmem:[%s1739_s5 + $0x98] sm:$0xff]  ;;  %s1949_s1 = sld [smem:[#allocation19_spill]]  ;;  %s1951_s28 = sld [smem:[#allocation28_spill]] }
 0x28d   : > { %v930_v17 = vpack.c.bf16 %v545_v14, %v544_v12  ;;  %v932_v18 = vpack.c.bf16 %v563_v16, %v562_v15  ;;  %v546_v19 = vld [vmem:[%s1739_s5 + $0x10] sm:$0xff]  ;;  %v547_v20 = vld [vmem:[%s1739_s5 + $0x18] sm:$0xff]  ;;  %v564_v21 = vld [vmem:[%s1739_s5 + $0xa0] sm:$0xff]  ;;  %s1953_s8 = sand.u32 1, %s1340_s19  }
 0x28e   : > { %929 = vmatprep.subr.bf16.mxu0 %v928_v13  ;;  %v565_v22 = vld [vmem:[%s1739_s5 + $0xa8] sm:$0xff]  ;;  %v934_v23 = vpack.c.bf16 %v547_v20, %v546_v19  ;;  %v548_v25 = vld [vmem:[%s1739_s5 + $0x20] sm:$0xff]  ;;  %v566_v27 = vld [vmem:[%s1739_s5 + $0xb0] sm:$0xff] }
 0x28f   : > { %931 = vmatpush3.bf16.msra.mxu0 %v930_v17  ;;  %v936_v24 = vpack.c.bf16 %v565_v22, %v564_v21  ;;  %v549_v26 = vld [vmem:[%s1739_s5 + $0x28] sm:$0xff]  ;;  %v567_v28 = vld [vmem:[%s1739_s5 + $0xb8] sm:$0xff]  ;;  %v550_v31 = vld [vmem:[%s1739_s5 + $0x30] sm:$0xff] }
 0x290   : > { %933 = vmatprep.subr.bf16.mxu0 %v932_v18  ;;  %v938_v29 = vpack.c.bf16 %v549_v26, %v548_v25  ;;  %v940_v30 = vpack.c.bf16 %v567_v28, %v566_v27  ;;  %v551_v32 = vld [vmem:[%s1739_s5 + $0x38] sm:$0xff]  ;;  %v568_v33 = vld [vmem:[%s1739_s5 + $0xc0] sm:$0xff]  ;;  %v569_v34 = vld [vmem:[%s1739_s5 + $0xc8] sm:$0xff] }
 0x291   : > { %v543_v35 = vld [vmem:[#allocation2 + $0x8] sm:$0xff]  ;;  %v942_v36 = vpack.c.bf16 %v551_v32, %v550_v31  ;;  %v944_v37 = vpack.c.bf16 %v569_v34, %v568_v33  ;;  %v552_v38 = vld [vmem:[%s1739_s5 + $0x40] sm:$0xff]  ;;  %v553_v39 = vld [vmem:[%s1739_s5 + $0x48] sm:$0xff]  ;;  %s824_s2 = sshll.u32 %s1947_s10, 1 }
 0x292   : > { %647 = vmatprep.mubr.f32.mxu0 %v543_v35  ;;  %v570_v40 = vld [vmem:[%s1739_s5 + $0xd0] sm:$0xff]  ;;  %v571_v41 = vld [vmem:[%s1739_s5 + $0xd8] sm:$0xff]  ;;  %v946_v42 = vpack.c.bf16 %v553_v39, %v552_v38  ;;  %v572_v46 = vld [vmem:[%s1739_s5 + $0xe0] sm:$0xff]  ;;  %s666_s13 = sadd.s32 %s1948_s24, %s824_s2  ;;  %s1952_s0 = smov %s1951_s28 }
 0x293   : > { %935 = vmatpush3.bf16.msra.mxu0 %v934_v23  ;;  %v948_v43 = vpack.c.bf16 %v571_v41, %v570_v40  ;;  %v554_v44 = vld [vmem:[%s1739_s5 + $0x50] sm:$0xff]  ;;  %v555_v45 = vld [vmem:[%s1739_s5 + $0x58] sm:$0xff]  ;;  %v573_v47 = vld [vmem:[%s1739_s5 + $0xe8] sm:$0xff]  ;;  %s825_s12 = sshll.u32 %s666_s13, 7  ;;  %p1954_p11 = scmp.ne.s32.totalorder %s1949_s1, 0 }
 0x294   : > { %937 = vmatprep.subr.bf16.mxu0 %v936_v24  ;;  %v950_v48 = vpack.c.bf16 %v555_v45, %v554_v44  ;;  %v952_v49 = vpack.c.bf16 %v573_v47, %v572_v46  ;;  %v556_v50 = vld [vmem:[%s1739_s5 + $0x60] sm:$0xff]  ;;  %v557_v51 = vld [vmem:[%s1739_s5 + $0x68] sm:$0xff]  ;;  %v574_v52 = vld [vmem:[%s1739_s5 + $0xf0] sm:$0xff]  ;;  %s1808_s3 = scalar_lea.hbm %s1951_s28, %s825_s12  ;;  %s1398_s24 = smov [#allocation11]  }
 0x295   : > { %v575_v53 = vld [vmem:[%s1739_s5 + $0xf8] sm:$0xff]  ;;  %v954_v54 = vpack.c.bf16 %v557_v51, %v556_v50  ;;  %v558_v56 = vld [vmem:[%s1739_s5 + $0x70] sm:$0xff]  ;;  %v542_v59 = vld [vmem:[#allocation2] sm:$0xff]  ;;  %s1238_s2 = sshll.u32 %s1398_s24, 4  ;;  %s1239_s2 = int_to_ptr.vmem [resolvable:$false] %s1238_s2 }
 0x296   : > { %v956_v55 = vpack.c.bf16 %v575_v53, %v574_v52  ;;  %v559_v57 = vld [vmem:[%s1739_s5 + $0x78] sm:$0xff]  ;;  %v822_v61 = vld [vmem:[%s334_s7] ss:$0 sm:$0xff]  ;;  %s670_s5 = sshll.u32 %s331_s15, 4  ;;  %s655_s7 = scalar_lea.sflag [#allocation5], %s1953_s8  ;;  %s1810_s5 = int_to_ptr.vmem [resolvable:$true] %s670_s5 }
 0x297   : > { %939 = vmatpush3.bf16.msra.mxu0 %v938_v29  ;;  %v958_v58 = vpack.c.bf16 %v559_v57, %v558_v56  ;;  %s1234_s10 = scalar_lea.vmem %s1810_s5, 128  ;;  %s1240_s13 = scalar_lea.vmem %s1239_s2, 256 }
 0x298   : > { %941 = vmatprep.subr.bf16.mxu0 %v940_v30  ;;  %p1235_p13 = scmp.ne.s32.totalorder %s1810_s5, %s1234_s10  ;;  %p1241_p1 = scmp.lt.s32.totalorder %s1810_s5, %s1239_s2 }
 0x299   : > { %p1242_p6 = scmp.lt.s32.totalorder %s1240_s13, %s1234_s10 }
 0x29a   : > { %p1236_p3 = pnand %p1235_p13, %p1954_p11 }
 0x29b   : > { %943 = vmatpush3.bf16.msra.mxu0 %v942_v36  ;;  %p1243_p7 = por %p1242_p6, %p1241_p1 }
 0x29c   : > { %945 = vmatprep.subr.bf16.mxu0 %v944_v37  ;;  %p1237_p5 = pneg %p1236_p3 }
 0x29e   : > { %p1244_p8 = pnand %p1243_p7, %p1237_p5 }
 0x29f   : > { %947 = vmatpush3.bf16.msra.mxu0 %v946_v42 }
 0x2a0   : > { %949 = vmatprep.subr.bf16.mxu0 %v948_v43 }
 0x2a3   : > { %951 = vmatpush3.bf16.msra.mxu0 %v950_v48 }
 0x2a4   : > { %953 = vmatprep.subr.bf16.mxu0 %v952_v49 }
 0x2a7   : > { %955 = vmatpush3.bf16.msra.mxu0 %v954_v54 }
 0x2a8   : > { %957 = vmatprep.subr.bf16.mxu0 %v956_v55 }
 0x2ab   : > { %959 = vmatpush3.bf16.msra.mxu0 %v958_v58 }
 0x2ae   : > { %648 = vmatmul.mubr.f32.vlgmr.msra.gmra.mrb[0].mxu0 %v542_v59 }
 0x381   : > { %v861_v60 = vpop.f32.mrb[0].mxu0 }
 0x382   : > { %v862_v62 = vpop.f32.mrb[1].mxu0 }
 0x383   : > { %v863_v63 = vadd.f32 %v862_v62, %v861_v60 }
 0x385   : > { %v650_v0 = vadd.f32 %v863_v63, %v822_v61 }
 0x387   : > { %653 = vst [vmem:[%s331_s15] sm:$0xff] %v650_v0 }
 0x388   : > { %1247 = shalt.err (!%p1244_p8)
}
 0x389   : > { %s1248_s28 = scalar_lea.hbm %s1808_s3, 128  ;;  %s1252_s4 = scalar_lea.hbm %s1952_s0, 512 }
 0x38a   : > { %p1249_p2 = scmp.ne.s32.totalorder %s1808_s3, %s1248_s28  ;;  %p1253_p4 = scmp.lt.u32.totalorder %s1808_s3, %s1952_s0 }
 0x38b   : > { %p1254_p12 = scmp.lt.u32.totalorder %s1252_s4, %s1248_s28  ;;  %p1256_p13 = scmp.lt.u32.totalorder %s1248_s28, %s1808_s3 }
 0x38c   : > { %p1250_p10 = pnand %p1249_p2, %p1954_p11 }
 0x38d   : > { %p1255_p0 = por %p1254_p12, %p1253_p4 }
 0x38e   : > { %p1251_p9 = pneg %p1250_p10 }
 0x38f   : > { %p1257_p3 = por %p1256_p13, %p1255_p0 }
 0x391   : > { %p1258_p5 = pnand %p1257_p3, %p1251_p9 }
 0x393   : > { %1261 = shalt.err (!%p1258_p5)
}
 0x394   : > { %972 = dma.vmem_to_hbm [thread:$0]  (%p1954_p11), %s1810_s5, 128, %s1808_s3, %s655_s7  }
 0x395 PF: > { %s1955_s12 = sld [smem:[#allocation16_spill]]  ;;  %s1956_s16 = sld [smem:[#allocation20_spill]] }
 0x396   : > { %p997_p1 = scmp.ge.s32.totalorder %s1388_s6, 2 }
 0x39b   : > { %s682_s21 = sand.u32 1, %s1955_s12   ;;  %p1957_p6 = scmp.ne.s32.totalorder %s1956_s16, 0 }
 0x39c   : > { %s683_s8 = scalar_lea.sflag [#allocation5], %s682_s21 }
 0x39d   : > { %p989_p7 = pnand %p997_p1, %p1957_p6 }
 0x39f   : > { %1331 = dma.done.wait (!%p989_p7), %s683_s8, 128  }
 0x3a0   : > { %1333 = vsyncadd (!%p989_p7), %s683_s8, 4294967168  ;;  %s25_s6 = sadd.s32 1, %s1388_s6   ;;  %s1959_s3 = sld [smem:[#allocation21_spill]] }
 0x3a1   : > { %p1842_p8 = scmp.ge.s32.totalorder %s25_s6, 6   ;;  %s1960_s1 = sld [smem:[#allocation22_spill]] }
 0x3a2   : > { %s1961_s18 = smov %s1340_s19  ;;  %s1962_s19 = smov %s1344_s20 }
 0x3a3   : > { %s1963_s20 = smov %s1634_s27  ;;  %s1964_s21 = smov %s1352_s22 }
 0x3a4   : > { %s1965_s22 = smov %s1356_s23  ;;  %s1966_s23 = smov %s1620_s14 }
 0x3a5   : > { %s1967_s24 = smov %s1364_s25  ;;  %s1968_s25 = smov %s1368_s26 }
 0x3a6   : > { %s1969_s26 = smov %s1623_s17  ;;  %s1970_s27 = smov %s1380_s29 }
 0x3a7   : > { %s1971_s28 = smov %s1384_s30  ;;  %s1972_s29 = smov %s1959_s3 }
 0x3a8   : > { %s1973_s30 = smov %s1960_s1  ;;  %24 = sbr.rel (!%p1842_p8) target bundleno = 20 (0x14), region = 115 }
 0x3af   :  { %688 = vsyncpa [#allocation4], 1 }
 0x3b0   :  { %690 = vsyncpa [#allocation4 + $0x1], 1 }
 0x3b1   :  { %691 = vsyncpa [#allocation7], 1 }
 0x3b2   :  { %692 = vsyncpa [#allocation10], 1 }
 0x3b3   :  { %694 = vsyncpa [#allocation10 + $0x1], 1 }
 0x3b4   :  { %695 = vsyncpa [#allocation5], 1 }
 0x3b5   :  { %697 = vsyncpa [#allocation5 + $0x1], 1 }

</bundles_post_ra>
